<compile_context>
chip_gen: v7x
topology: tpu7x:2x2x1
jax: 0.10.0
libtpu: 0.0.40
codegen_flags: <defaults>
</compile_context>

<pallas_src>
import functools

import jax
import jax.numpy as jnp
from jax import lax
from jax.experimental import pallas as pl
from jax.experimental.pallas import tpu as pltpu


_LANES = 256            # lane width of the flattened slab (multiple of 128)
_MAX_TILE_ROWS = 1024   # sublane rows per grid step (1 MiB of f32 SR / step)
_NUM_CORE_SPLITS = 2    # leading "parallel" grid axis -> both TCs on v7x


def _cdiv(a, b):
    return -(-a // b)


def _round_up(x, m):
    return _cdiv(x, m) * m


# ---------------------------------------------------------------------------
# Kernels
# ---------------------------------------------------------------------------
def _accumulate(step, sr, hr, res, row0, valid_rows, acc0_ref, acc1_ref):
    """Accumulate squared diffs of one tile into the resident accumulators."""

    @pl.when(step == 0)
    def _():
        acc0_ref[...] = jnp.zeros_like(acc0_ref)
        acc1_ref[...] = jnp.zeros_like(acc1_ref)

    # Rows past the end of the slab (grid over-run / duplicated tail block)
    # contribute nothing; zero lane-padding inside the slab is naturally a
    # no-op.  Mask is applied after squaring so NaN/Inf garbage cannot leak.
    rows = row0 + lax.broadcasted_iota(jnp.int32, sr.shape, 0)
    valid = rows < valid_rows

    d0 = sr - hr          # SR - HR
    d1 = d0 + res         # SR - HR + RES
    acc0_ref[0] += jnp.where(valid, d0 * d0, 0.0)
    acc1_ref[0] += jnp.where(valid, d1 * d1, 0.0)


def _fused_kernel(sr_ref, hrlr_ref, acc0_ref, acc1_ref, *,
                  steps_per_core, tile_rows, valid_rows):
    """HR_LR arrives interleaved ([HR, RES, HR, RES, ...] along lanes)."""
    core = pl.program_id(0)
    step = pl.program_id(1)
    sr = sr_ref[...].astype(jnp.float32)
    # In-kernel deinterleave: stride-2 lane slices of the single HR_LR tile.
    hr = hrlr_ref[:, pl.ds(0, _LANES, stride=2)].astype(jnp.float32)
    res = hrlr_ref[:, pl.ds(1, _LANES, stride=2)].astype(jnp.float32)
    row0 = (core * steps_per_core + step) * tile_rows
    _accumulate(step, sr, hr, res, row0, valid_rows, acc0_ref, acc1_ref)


def _split_kernel(sr_ref, hr_ref, res_ref, acc0_ref, acc1_ref, *,
                  steps_per_core, tile_rows, valid_rows):
    """Fallback: HR and RES arrive as separate dense planes."""
    core = pl.program_id(0)
    step = pl.program_id(1)
    sr = sr_ref[...].astype(jnp.float32)
    hr = hr_ref[...].astype(jnp.float32)
    res = res_ref[...].astype(jnp.float32)
    row0 = (core * steps_per_core + step) * tile_rows
    _accumulate(step, sr, hr, res, row0, valid_rows, acc0_ref, acc1_ref)


# ---------------------------------------------------------------------------
# Host-side plumbing
# ---------------------------------------------------------------------------
def _layout(n):
    """Static tiling parameters for n flattened SR elements."""
    n_pad = _round_up(n, 8 * _LANES)        # rows become a multiple of 8
    rows = n_pad // _LANES
    tile_rows = min(_MAX_TILE_ROWS, rows)
    row_blocks = _cdiv(rows, tile_rows)
    steps_per_core = _cdiv(row_blocks, _NUM_CORE_SPLITS)
    return n_pad, rows, tile_rows, row_blocks, steps_per_core


def _as_slab(flat, padded_len, lanes):
    n = flat.shape[0]
    if n != padded_len:
        flat = jnp.pad(flat, (0, padded_len - n))
    return flat.reshape(padded_len // lanes, lanes)


def _run(kernel, operands, lane_widths, n, rows, tile_rows, row_blocks,
         steps_per_core):
    last_block = row_blocks - 1

    def in_index(core, step):
        # Clamp so a dummy trailing step on core 1 never issues an OOB DMA;
        # its contribution is removed by the in-kernel row mask.
        return (jnp.minimum(core * steps_per_core + step, last_block), 0)

    in_specs = [pl.BlockSpec((tile_rows, lw), in_index) for lw in lane_widths]

    acc_shape = (_NUM_CORE_SPLITS, tile_rows, _LANES)
    acc_spec = pl.BlockSpec((1, tile_rows, _LANES),
                            lambda core, step: (core, 0, 0))

    in_bytes = sum(rows * lw * 4 for lw in lane_widths)
    acc_bytes = 2 * _NUM_CORE_SPLITS * tile_rows * _LANES * 4

    acc0, acc1 = pl.pallas_call(
        functools.partial(kernel, steps_per_core=steps_per_core,
                          tile_rows=tile_rows, valid_rows=rows),
        grid=(_NUM_CORE_SPLITS, steps_per_core),
        in_specs=in_specs,
        out_specs=(acc_spec, acc_spec),
        out_shape=(jax.ShapeDtypeStruct(acc_shape, jnp.float32),
                   jax.ShapeDtypeStruct(acc_shape, jnp.float32)),
        compiler_params=pltpu.CompilerParams(
            dimension_semantics=("parallel", "arbitrary")),
        cost_estimate=pl.CostEstimate(flops=6 * n, transcendentals=0,
                                      bytes_accessed=in_bytes + acc_bytes),
    )(*operands)
    return jnp.sum(acc0), jnp.sum(acc1)


def _sr_loss_fused(sr_flat, hrlr_flat, loss_ratio):
    n = sr_flat.shape[0]
    n_pad, rows, tile_rows, row_blocks, steps = _layout(n)
    sr2 = _as_slab(sr_flat, n_pad, _LANES)
    hrlr2 = _as_slab(hrlr_flat, 2 * n_pad, 2 * _LANES)
    sse0, sse1 = _run(_fused_kernel, (sr2, hrlr2), (_LANES, 2 * _LANES),
                      n, rows, tile_rows, row_blocks, steps)
    return ((1.0 - loss_ratio) * sse0 + loss_ratio * sse1) / float(n)


def _sr_loss_split(sr_flat, hr_flat, res_flat, loss_ratio):
    n = sr_flat.shape[0]
    n_pad, rows, tile_rows, row_blocks, steps = _layout(n)
    sr2 = _as_slab(sr_flat, n_pad, _LANES)
    hr2 = _as_slab(hr_flat, n_pad, _LANES)
    res2 = _as_slab(res_flat, n_pad, _LANES)
    sse0, sse1 = _run(_split_kernel, (sr2, hr2, res2),
                      (_LANES, _LANES, _LANES),
                      n, rows, tile_rows, row_blocks, steps)
    return ((1.0 - loss_ratio) * sse0 + loss_ratio * sse1) / float(n)


_FUSED_OK = None


def _fused_path_ok():
    """One-time probe: does this Mosaic build lower stride-2 lane slices?

    If the fused in-kernel HR/RES split is rejected (or produces a wrong
    value), fall back to the wrapper-side split, which keeps every other
    optimization (tiled pipelined grid, resident accumulators, lane-dense
    layout, dual-core split).
    """
    global _FUSED_OK
    if _FUSED_OK is None:
        try:
            with jax.ensure_compile_time_eval():
                n = 8 * _LANES
                sr = (jnp.arange(n, dtype=jnp.float32) % 17.0) * 0.25 - 2.0
                hrlr = (jnp.arange(2 * n, dtype=jnp.float32) % 13.0) * 0.125 - 0.75
                got = float(_sr_loss_fused(sr, hrlr, 0.8))
                hr, res = hrlr[0::2], hrlr[1::2]
                want = float(0.2 * jnp.mean((sr - hr) ** 2)
                             + 0.8 * jnp.mean((sr - hr + res) ** 2))
            _FUSED_OK = abs(got - want) <= 1e-4 * max(1.0, abs(want))
        except Exception:   # lowering / compile rejection -> safe fallback
            _FUSED_OK = False
    return _FUSED_OK


def sr_loss(SR_image, HR_LR_image, loss_ratio=0.8):
    """JAX/Pallas equivalent of SR_loss.forward."""
    if HR_LR_image.ndim not in (3, 4):
        raise ValueError("HR_LR_image must be 3D or 4D")
    if HR_LR_image.shape[-1] != 2:
        raise ValueError("HR_LR_image's trailing axis must have size 2")
    if tuple(SR_image.shape) != tuple(HR_LR_image.shape[:-1]):
        raise ValueError("SR_image and HR_LR_image shapes are inconsistent")

    sr_flat = SR_image.reshape(-1)
    if _fused_path_ok():
        # Interleaved [HR0, RES0, HR1, RES1, ...]; the split happens in-kernel.
        return _sr_loss_fused(sr_flat, HR_LR_image.reshape(-1), loss_ratio)
    hr_flat = HR_LR_image[..., 0].reshape(-1)
    res_flat = HR_LR_image[..., 1].reshape(-1)
    return _sr_loss_split(sr_flat, hr_flat, res_flat, loss_ratio)


def _ref_sr_loss(SR_image, HR_LR_image, loss_ratio=0.8):
    """Pure-JAX reference (mirrors the PyTorch forward)."""
    hr = HR_LR_image[..., 0]
    res = HR_LR_image[..., 1]
    return ((1.0 - loss_ratio) * jnp.mean((SR_image - hr) ** 2)
            + loss_ratio * jnp.mean((SR_image - hr + res) ** 2))


if __name__ == "__main__":
    key = jax.random.PRNGKey(0)
    k1, k2, k3, k4 = jax.random.split(key, 4)

    # 4D case: SR (B, H, W), HR_LR (B, H, W, 2)
    B, H, W = 2, 16, 16
    sr4 = jax.random.normal(k1, (B, H, W), dtype=jnp.float32)
    hrlr4 = jax.random.normal(k2, (B, H, W, 2), dtype=jnp.float32)
    loss4 = sr_loss(sr4, hrlr4, loss_ratio=0.8)
    jax.block_until_ready(loss4)
    ref4 = _ref_sr_loss(sr4, hrlr4, loss_ratio=0.8)
    assert jnp.allclose(loss4, ref4, rtol=1e-5, atol=1e-5), (loss4, ref4)

    # 3D case: SR (H, W), HR_LR (H, W, 2)
    sr3 = jax.random.normal(k3, (H, W), dtype=jnp.float32)
    hrlr3 = jax.random.normal(k4, (H, W, 2), dtype=jnp.float32)
    loss3 = sr_loss(sr3, hrlr3, loss_ratio=0.8)
    jax.block_until_ready(loss3)
    ref3 = _ref_sr_loss(sr3, hrlr3, loss_ratio=0.8)
    assert jnp.allclose(loss3, ref3, rtol=1e-5, atol=1e-5), (loss3, ref3)

    print("KERNEL_OK")
</pallas_src>

<mosaic_0001>
module attributes {stable_mosaic.version = 11 : i64} {
  func.func @_split_kernel(%arg0: i32, %arg1: i32, %arg2: memref<8x256xf32, #tpu.memory_space<vmem>>, %arg3: memref<8x256xf32, #tpu.memory_space<vmem>>, %arg4: memref<8x256xf32, #tpu.memory_space<vmem>>, %arg5: memref<1x8x256xf32, #tpu.memory_space<vmem>>, %arg6: memref<1x8x256xf32, #tpu.memory_space<vmem>>) attributes {dimension_semantics = [#tpu.dimension_semantics<parallel>, #tpu.dimension_semantics<arbitrary>], iteration_bounds = array<i64: 2, 1>, scalar_prefetch = 0 : i64, scratch_operands = 0 : i64, tpu.core_type = #tpu.core_type<tc>, window_params = [{transform_indices = @transform_0, window_bounds = array<i64: 8, 256>}, {transform_indices = @transform_1, window_bounds = array<i64: 8, 256>}, {transform_indices = @transform_2, window_bounds = array<i64: 8, 256>}, {transform_indices = @transform_3, window_bounds = array<i64: 1, 8, 256>}, {transform_indices = @transform_4, window_bounds = array<i64: 1, 8, 256>}]} {
    %c0 = arith.constant 0 : index
    %c0_0 = arith.constant 0 : index
    %0 = vector.load %arg2[%c0, %c0_0] : memref<8x256xf32, #tpu.memory_space<vmem>>, vector<8x256xf32>
    %c0_1 = arith.constant 0 : index
    %c0_2 = arith.constant 0 : index
    %1 = vector.load %arg3[%c0_1, %c0_2] : memref<8x256xf32, #tpu.memory_space<vmem>>, vector<8x256xf32>
    %c0_3 = arith.constant 0 : index
    %c0_4 = arith.constant 0 : index
    %2 = vector.load %arg4[%c0_3, %c0_4] : memref<8x256xf32, #tpu.memory_space<vmem>>, vector<8x256xf32>
    %c1_i32 = arith.constant 1 : i32
    %3 = arith.muli %arg0, %c1_i32 : i32
    %4 = arith.addi %3, %arg1 : i32
    %c8_i32 = arith.constant 8 : i32
    %5 = arith.muli %4, %c8_i32 : i32
    %c0_i32 = arith.constant 0 : i32
    %6 = arith.cmpi eq, %arg1, %c0_i32 : i32
    %7 = arith.extui %6 : i1 to i32
    %c0_i32_5 = arith.constant 0 : i32
    %8 = arith.cmpi ne, %7, %c0_i32_5 : i32
    scf.if %8 {
      %cst_20 = arith.constant 0.000000e+00 : f32
      %34 = vector.broadcast %cst_20 : f32 to vector<1x8x256xf32>
      %c0_21 = arith.constant 0 : index
      %c0_22 = arith.constant 0 : index
      %c0_23 = arith.constant 0 : index
      %35 = vector.load %arg5[%c0_21, %c0_22, %c0_23] : memref<1x8x256xf32, #tpu.memory_space<vmem>>, vector<1x8x256xf32>
      tpu.vector_store %arg5[%c0_21, %c0_22, %c0_23], %34 {strides = array<i32>} : memref<1x8x256xf32, #tpu.memory_space<vmem>>, vector<1x8x256xf32>,
      %cst_24 = arith.constant 0.000000e+00 : f32
      %36 = vector.broadcast %cst_24 : f32 to vector<1x8x256xf32>
      %c0_25 = arith.constant 0 : index
      %c0_26 = arith.constant 0 : index
      %c0_27 = arith.constant 0 : index
      %37 = vector.load %arg6[%c0_25, %c0_26, %c0_27] : memref<1x8x256xf32, #tpu.memory_space<vmem>>, vector<1x8x256xf32>
      tpu.vector_store %arg6[%c0_25, %c0_26, %c0_27], %36 {strides = array<i32>} : memref<1x8x256xf32, #tpu.memory_space<vmem>>, vector<1x8x256xf32>,
    } else {
    }
    %9 = tpu.iota {dimensions = array<i32: 0>} : vector<8x256xi32>
    %10 = vector.broadcast %5 : i32 to vector<8x256xi32>
    %11 = arith.addi %10, %9 : vector<8x256xi32>
    %c8_i32_6 = arith.constant 8 : i32
    %12 = vector.broadcast %c8_i32_6 : i32 to vector<8x256xi32>
    %13 = arith.cmpi slt, %11, %12 : vector<8x256xi32>
    %14 = arith.subf %0, %1 : vector<8x256xf32>
    %15 = arith.addf %14, %2 : vector<8x256xf32>
    %c0_7 = arith.constant 0 : index
    %c0_8 = arith.constant 0 : index
    %c0_9 = arith.constant 0 : index
    %16 = vector.load %arg5[%c0_7, %c0_8, %c0_9] : memref<1x8x256xf32, #tpu.memory_space<vmem>>, vector<1x8x256xf32>
    %17 = vector.shape_cast %16 : vector<1x8x256xf32> to vector<8x256xf32>
    %18 = arith.mulf %14, %14 : vector<8x256xf32>
    %cst = arith.constant 0.000000e+00 : f32
    %19 = vector.broadcast %cst : f32 to vector<8x256xf32>
    %20 = arith.select %13, %18, %19 : vector<8x256xi1>, vector<8x256xf32>
    %21 = arith.addf %17, %20 : vector<8x256xf32>
    %c0_10 = arith.constant 0 : index
    %c0_11 = arith.constant 0 : index
    %c0_12 = arith.constant 0 : index
    %22 = vector.load %arg5[%c0_10, %c0_11, %c0_12] : memref<1x8x256xf32, #tpu.memory_space<vmem>>, vector<1x8x256xf32>
    %23 = vector.shape_cast %22 : vector<1x8x256xf32> to vector<8x256xf32>
    %24 = vector.shape_cast %21 : vector<8x256xf32> to vector<1x8x256xf32>
    tpu.vector_store %arg5[%c0_10, %c0_11, %c0_12], %24 {strides = array<i32>} : memref<1x8x256xf32, #tpu.memory_space<vmem>>, vector<1x8x256xf32>,
    %c0_13 = arith.constant 0 : index
    %c0_14 = arith.constant 0 : index
    %c0_15 = arith.constant 0 : index
    %25 = vector.load %arg6[%c0_13, %c0_14, %c0_15] : memref<1x8x256xf32, #tpu.memory_space<vmem>>, vector<1x8x256xf32>
    %26 = vector.shape_cast %25 : vector<1x8x256xf32> to vector<8x256xf32>
    %27 = arith.mulf %15, %15 : vector<8x256xf32>
    %cst_16 = arith.constant 0.000000e+00 : f32
    %28 = vector.broadcast %cst_16 : f32 to vector<8x256xf32>
    %29 = arith.select %13, %27, %28 : vector<8x256xi1>, vector<8x256xf32>
    %30 = arith.addf %26, %29 : vector<8x256xf32>
    %c0_17 = arith.constant 0 : index
    %c0_18 = arith.constant 0 : index
    %c0_19 = arith.constant 0 : index
    %31 = vector.load %arg6[%c0_17, %c0_18, %c0_19] : memref<1x8x256xf32, #tpu.memory_space<vmem>>, vector<1x8x256xf32>
    %32 = vector.shape_cast %31 : vector<1x8x256xf32> to vector<8x256xf32>
    %33 = vector.shape_cast %30 : vector<8x256xf32> to vector<1x8x256xf32>
    tpu.vector_store %arg6[%c0_17, %c0_18, %c0_19], %33 {strides = array<i32>} : memref<1x8x256xf32, #tpu.memory_space<vmem>>, vector<1x8x256xf32>,
    return
  }
  func.func @transform_0(%arg0: i32, %arg1: i32) -> (i32, i32) {
    %c1_i32 = arith.constant 1 : i32
    %0 = arith.muli %arg0, %c1_i32 : i32
    %1 = arith.addi %0, %arg1 : i32
    %c0_i32 = arith.constant 0 : i32
    %2 = arith.minsi %1, %c0_i32 : i32
    %c0_i32_0 = arith.constant 0 : i32
    %c0_i32_1 = arith.constant 0 : i32
    return %2, %c0_i32_0 : i32, i32
  }
  func.func @transform_1(%arg0: i32, %arg1: i32) -> (i32, i32) {
    %c1_i32 = arith.constant 1 : i32
    %0 = arith.muli %arg0, %c1_i32 : i32
    %1 = arith.addi %0, %arg1 : i32
    %c0_i32 = arith.constant 0 : i32
    %2 = arith.minsi %1, %c0_i32 : i32
    %c0_i32_0 = arith.constant 0 : i32
    %c0_i32_1 = arith.constant 0 : i32
    return %2, %c0_i32_0 : i32, i32
  }
  func.func @transform_2(%arg0: i32, %arg1: i32) -> (i32, i32) {
    %c1_i32 = arith.constant 1 : i32
    %0 = arith.muli %arg0, %c1_i32 : i32
    %1 = arith.addi %0, %arg1 : i32
    %c0_i32 = arith.constant 0 : i32
    %2 = arith.minsi %1, %c0_i32 : i32
    %c0_i32_0 = arith.constant 0 : i32
    %c0_i32_1 = arith.constant 0 : i32
    return %2, %c0_i32_0 : i32, i32
  }
  func.func @transform_3(%arg0: i32, %arg1: i32) -> (i32, i32, i32) {
    %c0_i32 = arith.constant 0 : i32
    %c0_i32_0 = arith.constant 0 : i32
    %c0_i32_1 = arith.constant 0 : i32
    return %arg0, %c0_i32, %c0_i32_0 : i32, i32, i32
  }
  func.func @transform_4(%arg0: i32, %arg1: i32) -> (i32, i32, i32) {
    %c0_i32 = arith.constant 0 : i32
    %c0_i32_0 = arith.constant 0 : i32
    %c0_i32_1 = arith.constant 0 : i32
    return %arg0, %c0_i32, %c0_i32_0 : i32, i32, i32
  }
}

</mosaic_0001>

<bundles_post_ra>
// kernel: tpu_custom_call.1
= control target key start
LH: loop header
LB: loop body
LE: loop exit
PB: predicated region body
PF: predicated region fallthrough
CT: control target
= control target key end

     0   :  { %s1244_s0 = inlined_call_operand.hbm [shape: f32[8,256], index: 0, kind: input, shape index: {}]   ;;  %s1245_s1 = inlined_call_operand.hbm [shape: f32[8,256], index: 1, kind: input, shape index: {}]   ;;  %s1246_s2 = inlined_call_operand.hbm [shape: f32[8,256], index: 2, kind: input, shape index: {}]   ;;  %s1247_s3 = inlined_call_operand.hbm [shape: f32[2,8,256], index: 3, kind: output, shape index: {0}]   ;;  %s1248_s4 = inlined_call_operand.hbm [shape: f32[2,8,256], index: 4, kind: output, shape index: {1}]  }
   0x1   :  { %1255 = sst [smem:[#allocation17_spill]] %s1245_s1 }
   0x2   :  { %10 = vsyncpa [#allocation3], 0 }
   0x3   :  { %12 = vsyncpa [#allocation3 + $0x1], 0 }
   0x4   :  { %13 = vsyncpa [#allocation6], 0 }
   0x5   :  { %15 = vsyncpa [#allocation6 + $0x1], 0 }
   0x6   :  { %16 = vsyncpa [#allocation4], 0 }
   0x7   :  { %18 = vsyncpa [#allocation4 + $0x1], 0 }
   0x8   :  { %19 = vsyncpa [#allocation10], 0 }
   0x9   :  { %21 = vsyncpa [#allocation10 + $0x1], 0  ;;  %s974_s15 = smov 0   ;;  %s976_s16 = smov 0  }
   0xa   :  { %s978_s17 = smov 0   ;;  %s980_s18 = smov 0  }
   0xb   :  { %s982_s19 = smov 0   ;;  %s984_s20 = smov 0  }
   0xc   :  { %s986_s21 = smov 0   ;;  %s988_s22 = smov 0  }
   0xd LB: > { %1256 = sst [smem:[#allocation15_spill]] %s938_s21  ;;  %s1013_s23 = sadd.s32 4294967295, %s942_s22   ;;  %s942_s22 = sphi %s988_s22, %s27_s22   ;;  %s938_s21 = sphi %s986_s21, %s1276_s21   ;;  %s934_s20 = sphi %s984_s20, %s1275_s20   ;;  %s930_s19 = sphi %s982_s19, %s1234_s19   ;;  %s926_s18 = sphi %s980_s18, %s1280_s18   ;;  %s922_s17 = sphi %s978_s17, %s1279_s17   ;;  %s918_s16 = sphi %s976_s16, %s1278_s16   ;;  %s914_s15 = sphi %s974_s15, %s1277_s15  }
   0xe   : > { %s579_s24 = sadd.s32 4294967294, %s942_s22   ;;  %s39_s25 = sadd.s32 1, %s938_s21 }
   0xf   : > { %p41_p0 = scmp.ge.s32.totalorder %s39_s25, 2  ;;  %p911_p1 = scmp.ne.s32.totalorder %s930_s19, 0 }
  0x10   : > { %p60_p2 = scmp.eq.s32.totalorder %s942_s22, 0  ;;  %p65_p3 = scmp.ne.s32.totalorder %s930_s19, %s926_s18 }
  0x11   : > { %s1282_s25 = smov (%p41_p0, %s39_s25), 0  ;;  %p66_p5 = scmp.eq.s32.totalorder %s1013_s23, 0 }
  0x12   : > { %1257 = sst [smem:[#allocation16_spill]] %s1282_s25  ;;  %p1022_p4 = por %p911_p1, %p60_p2 }
  0x13   : > { %p1027_p6 = por %p66_p5, %p65_p3  ;;  %s139_s28 = ssub.s32 %s938_s21, %s1282_s25 }
  0x14   : > { %p140_p7 = scmp.eq.s32.totalorder %s139_s28, 0  ;;  %s142_s29 = sadd.s32 1, %s922_s17 }
  0x15   : > { %s1259_s27 = scalar_select %p1027_p6, 1, 0 }
  0x16   : > { %s1035_s30 = scalar_select %p140_p7, %s922_s17, %s142_s29  }
  0x17   : > { %p152_p8 = scmp.ne.s32.totalorder %s922_s17, %s918_s16  ;;  %p153_p9 = scmp.eq.s32.totalorder %s1013_s23, 1 }
  0x18   : > { %p158_p10 = scmp.ne.s32.totalorder %s918_s16, %s914_s15  ;;  %p159_p11 = scmp.eq.s32.totalorder %s579_s24, 1 }
  0x19   : > { %p1042_p12 = por %p153_p9, %p152_p8  ;;  %p638_p1 = scmp.lt.s32.totalorder %s942_s22, 2 }
  0x1a   : > { %p1047_p0 = por %p159_p11, %p158_p10  ;;  %s227_s8 = sand.u32 1, %s942_s22  }
  0x1b   : > { %s1260_s5 = scalar_select %p1042_p12, 1, 0 }
  0x1c   : > { %s1261_s6 = scalar_select %p1047_p0, 1, 0 }
  0x1d   : > { %p1054_p2 = pnand %p638_p1, %p1022_p4  ;;  %s944_s9 = smov [#allocation5]  }
  0x1e   : > { %s242_s10 = sshll.u32 %s944_s9, 4  ;;  %s1060_s11 = scalar_lea.sflag [#allocation6], %s227_s8  ;;  %s243_s10 = int_to_ptr.vmem [resolvable:$true] %s242_s10 }
  0x1f   : > { %s1262_s7 = scalar_select %p1054_p2, 1, 0 }
  0x20   : > { %s1263_s1 = sld [smem:[#allocation17_spill]]  ;;  %p1070_p4 = pneg %p1054_p2 }
  0x26   : > { %s713_s14 = scalar_lea.hbm %s1263_s1, 256 }
  0x27   : > { %p714_p5 = scmp.ne.s32.totalorder %s1263_s1, %s713_s14  ;;  %p720_p9 = scmp.lt.u32.totalorder %s713_s14, %s713_s14 }
  0x28   : > { %p722_p10 = scmp.lt.u32.totalorder %s713_s14, %s1263_s1 }
  0x29   : > { %p716_p7 = pnand %p1070_p4, %p714_p5 }
  0x2a   : > { %p723_p11 = por %p722_p10, %p720_p9 }
  0x2b   : > { %p717_p8 = pneg %p716_p7 }
  0x2d   : > { %p724_p1 = pnand %p723_p11, %p717_p8 }
  0x2f   : > { %727 = shalt.err (!%p724_p1)
}
  0x30   : > { %s728_s8 = scalar_lea.vmem %s243_s10, 256  ;;  %s735_s9 = scalar_lea.vmem %s243_s10, 512 }
  0x31   : > { %p729_p13 = scmp.ne.s32.totalorder %s243_s10, %s728_s8  ;;  %p736_p12 = scmp.lt.s32.totalorder %s243_s10, %s243_s10 }
  0x32   : > { %p737_p6 = scmp.lt.s32.totalorder %s735_s9, %s728_s8 }
  0x33   : > { %p731_p3 = pnand %p729_p13, %p1070_p4 }
  0x34   : > { %p738_p2 = por %p737_p6, %p736_p12 }
  0x35   : > { %p732_p0 = pneg %p731_p3 }
  0x37   : > { %p739_p5 = pnand %p738_p2, %p732_p0 }
  0x39   : > { %742 = shalt.err (!%p739_p5)
}
  0x3a   : > { %p1265_p7 = scmp.ne.s32.totalorder %s1262_s7, 0  ;;  %p269_p8 = scmp.lt.s32.totalorder %s942_s22, 3 }
  0x3b   : > { %p1266_p9 = scmp.ge.s32.totalorder %s942_s22, 1  ;;  %s945_s18 = smov [#allocation2]  }
  0x3c   : > { %627 = dma.hbm_to_vmem [thread:$0]  (!%p1265_p7), %s1263_s1, 256, %s243_s10, %s1060_s11  }
  0x3d   : > { %p1090_p13 = pnand %p1266_p9, %p269_p8  ;;  %s220_s24 = sshll.u32 %s945_s18, 4  ;;  %s221_s24 = int_to_ptr.vmem [resolvable:$true] %s220_s24 }
  0x3e   : > { %s743_s8 = scalar_lea.hbm %s1244_s0, 256 }
  0x3f   : > { %s1267_s14 = scalar_select %p1090_p13, 1, 0 }
  0x40   : > { %p744_p6 = scmp.ne.s32.totalorder %s1244_s0, %s743_s8  ;;  %p750_p2 = scmp.lt.u32.totalorder %s743_s8, %s743_s8 }
  0x41   : > { %p752_p3 = scmp.lt.u32.totalorder %s743_s8, %s1244_s0 }
  0x42   : > { %p746_p12 = pnand %p744_p6, %p1070_p4 }
  0x43   : > { %p753_p10 = por %p752_p3, %p750_p2 }
  0x44   : > { %p747_p0 = pneg %p746_p12 }
  0x46   : > { %p754_p11 = pnand %p753_p10, %p747_p0 }
  0x48   : > { %757 = shalt.err (!%p754_p11)
}
  0x49   : > { %s758_s13 = scalar_lea.vmem %s221_s24, 256  ;;  %s765_s18 = scalar_lea.vmem %s221_s24, 512 }
  0x4a   : > { %p759_p1 = scmp.ne.s32.totalorder %s221_s24, %s758_s13  ;;  %p766_p9 = scmp.lt.s32.totalorder %s221_s24, %s221_s24 }
  0x4b   : > { %p767_p13 = scmp.lt.s32.totalorder %s765_s18, %s758_s13 }
  0x4c   : > { %p761_p5 = pnand %p759_p1, %p1070_p4 }
  0x4d   : > { %p768_p7 = por %p767_p13, %p766_p9 }
  0x4e   : > { %p762_p8 = pneg %p761_p5 }
  0x50   : > { %p769_p6 = pnand %p768_p7, %p762_p8 }
  0x52   : > { %772 = shalt.err (!%p769_p6)
}
  0x53   : > { %p1268_p12 = scmp.ne.s32.totalorder %s1262_s7, 0  ;;  %s946_s29 = smov [#allocation7]  }
  0x54   : > { %s264_s8 = sshll.u32 %s946_s29, 4  ;;  %s773_s12 = scalar_lea.hbm %s1246_s2, 256  ;;  %s265_s8 = int_to_ptr.vmem [resolvable:$true] %s264_s8 }
  0x55   : > { %624 = dma.hbm_to_vmem [thread:$0]  (!%p1268_p12), %s1244_s0, 256, %s221_s24, [#allocation3]  }
  0x56   : > { %p774_p13 = scmp.ne.s32.totalorder %s1246_s2, %s773_s12  ;;  %p780_p2 = scmp.lt.u32.totalorder %s773_s12, %s773_s12 }
  0x57   : > { %p782_p3 = scmp.lt.u32.totalorder %s773_s12, %s1246_s2 }
  0x58   : > { %p776_p7 = pnand %p774_p13, %p1070_p4 }
  0x59   : > { %p783_p10 = por %p782_p3, %p780_p2 }
  0x5a   : > { %p777_p0 = pneg %p776_p7 }
  0x5c   : > { %p784_p11 = pnand %p783_p10, %p777_p0 }
  0x5e   : > { %787 = shalt.err (!%p784_p11)
}
  0x5f   : > { %s788_s24 = scalar_lea.vmem %s265_s8, 256  ;;  %s795_s25 = scalar_lea.vmem %s265_s8, 512 }
  0x60   : > { %p789_p1 = scmp.ne.s32.totalorder %s265_s8, %s788_s24  ;;  %p796_p9 = scmp.lt.s32.totalorder %s265_s8, %s265_s8 }
  0x61   : > { %p797_p6 = scmp.lt.s32.totalorder %s795_s25, %s788_s24 }
  0x62   : > { %p791_p5 = pnand %p789_p1, %p1070_p4 }
  0x63   : > { %p798_p12 = por %p797_p6, %p796_p9 }
  0x64   : > { %p792_p8 = pneg %p791_p5 }
  0x66   : > { %p799_p13 = pnand %p798_p12, %p792_p8 }
  0x68   : > { %802 = shalt.err (!%p799_p13)
}
  0x69   : > { %p1269_p7 = scmp.ne.s32.totalorder %s1262_s7, 0  ;;  %p1270_p0 = scmp.ne.s32.totalorder %s1267_s14, 0 }
  0x6a   : > { %s275_s26 = sand.u32 (!%p1270_p0), 1, %s930_s19   ;;  %p1271_p4 = scmp.ne.s32.totalorder (!%p1270_p0), %s1259_s27, 0 }
  0x6b   : > { %630 = dma.hbm_to_vmem [thread:$0]  (!%p1269_p7), %s1246_s2, 256, %s265_s8, %s1060_s11  }
  0x6c   : > { %273 = sbr.rel (%p1270_p0) target bundleno = 171 (0xab), region = 32  ;;  %s592_s28 = sshll.u32 (!%p1270_p0), %s275_s26, 4 }
  0x6d   : > { %s276_s29 = scalar_lea.sflag (!%p1270_p0), [#allocation3], %s275_s26  ;;  %s279_s9 = scalar_lea.vmem (!%p1270_p0), [#allocation2], %s592_s28 }
  0x73   : > { %896 = dma.done.wait (%p1271_p4), %s276_s29, 256  }
  0x74   : > { %898 = vsyncadd (%p1271_p4), %s276_s29, 4294967040  ;;  %s284_s7 = sand.u32 1, %s1013_s23   ;;  %s288_s12 = scalar_lea.vmem [#allocation5], %s592_s28 }
  0x75   : > { %s285_s10 = scalar_lea.sflag [#allocation6], %s284_s7 }
  0x76   : > { %900 = dma.done.wait (%p1271_p4), %s285_s10, 512  }
  0x77   : > { %902 = vsyncadd (%p1271_p4), %s285_s10, 4294966784  ;;  %s597_s11 = sshll.u32 %s934_s20, 3  ;;  %v362_v0 = vlaneseq  ;;  %s1145_s14 = sand.u32 1, %s918_s16   ;;  %v346_v4 = vld [vmem:[%s279_s9] sm:$0xff]  ;;  %v347_v6 = vld [vmem:[%s279_s9 + $0x8] sm:$0xff] }
  0x78   : > { %v364_v2 = vstv %s597_s11  ;;  %s595_s8 = sshll.u32 %s1145_s14, 4  ;;  %v348_v5 = vld [vmem:[%s288_s12] sm:$0xff]  ;;  %v349_v8 = vld [vmem:[%s288_s12 + $0x8] sm:$0xff]  ;;  %s297_s23 = scalar_lea.vmem [#allocation7], %s592_s28 }
  0x79   : > { %v363_v1 = vshrl.u32 %v362_v0, 7  ;;  %v367_v7 = vsub.f32 %v346_v4, %v348_v5  ;;  %v350_v9 = vld [vmem:[%s297_s23] sm:$0xff]  ;;  %v351_v10 = vld [vmem:[%s297_s23 + $0x8] sm:$0xff]  ;;  %v368_v11 = vsub.f32 %v347_v6, %v349_v8  ;;  %s609_s27 = sshll.u32 %s934_s20, 8  ;;  %s329_s13 = scalar_lea.vmem [#allocation8], %s595_s8 }
  0x7a   : > { %s411_s18 = sshll.u32 %s329_s13, 4  ;;  %s1151_s24 = scalar_lea.vmem [#allocation9], %s595_s8  ;;  %s1160_s18 = int_to_ptr.vmem [resolvable:$true] %s411_s18 }
  0x7b   : > { %v365_v3 = vadd.s32 %v364_v2, %v363_v1  ;;  %v373_v12 = vmul.f32 %v367_v7, %v367_v7  ;;  %v369_v13 = vadd.f32 %v367_v7, %v350_v9  ;;  %v374_v14 = vmul.f32 %v368_v11, %v368_v11  ;;  %s425_s25 = sshll.u32 %s1151_s24, 4  ;;  %s1158_s20 = scalar_lea.hbm %s1247_s3, %s609_s27  ;;  %s1168_s25 = int_to_ptr.vmem [resolvable:$true] %s425_s25 }
  0x7c   : > { %v370_v15 = vadd.f32 %v368_v11, %v351_v10  ;;  %s1166_s29 = scalar_lea.hbm %s1248_s4, %s609_s27  ;;  %s392_s9 = scalar_lea.sflag [#allocation4], %s1145_s14 }
  0x7d   : > { %vm366_vm0 = vcmp.lt.s32.totalorder %v365_v3, 8  ;;  %v383_v17 = vmul.f32 %v369_v13, %v369_v13  ;;  %s803_s7 = scalar_lea.vmem %s1160_s18, 256  ;;  %p1272_p2 = scmp.ne.s32.totalorder %s1260_s5, 0 }
  0x7e   : > { %v375_v16 = vsel %vm366_vm0, %v373_v12, 0.0  ;;  %v376_v18 = vsel %vm366_vm0, %v374_v14, 0.0  ;;  %v384_v19 = vmul.f32 %v370_v15, %v370_v15  ;;  %p804_p12 = scmp.ne.s32.totalorder %s1160_s18, %s803_s7  ;;  %s947_s10 = smov [#allocation8]  }
  0x7f   : > { %v385_v20 = vsel %vm366_vm0, %v383_v17, 0.0  ;;  %379 = vst [vmem:[%s329_s13] sm:$0xff] %v375_v16  ;;  %380 = vst [vmem:[%s329_s13 + $0x8] sm:$0xff] %v376_v18  ;;  %s807_s12 = sshll.u32 %s947_s10, 4  ;;  %s808_s12 = int_to_ptr.vmem [resolvable:$false] %s807_s12 }
  0x80   : > { %v386_v21 = vsel %vm366_vm0, %v384_v19, 0.0  ;;  %389 = vst [vmem:[%s1151_s24] sm:$0xff] %v385_v20  ;;  %p805_p3 = pnand %p804_p12, %p1272_p2  ;;  %s809_s11 = scalar_lea.vmem %s808_s12, 512 }
  0x81   : > { %p810_p11 = scmp.lt.s32.totalorder %s1160_s18, %s808_s12  ;;  %p811_p1 = scmp.lt.s32.totalorder %s809_s11, %s803_s7 }
  0x82   : > { %p806_p10 = pneg %p805_p3 }
  0x83   : > { %p812_p5 = por %p811_p1, %p810_p11 }
  0x85   : > { %p813_p8 = pnand %p812_p5, %p806_p10 }
  0x87   : > { %816 = shalt.err (!%p813_p8)
}
  0x88   : > { %s817_s8 = scalar_lea.hbm %s1158_s20, 256  ;;  %s821_s13 = scalar_lea.hbm %s1247_s3, 512 }
  0x89   : > { %p818_p9 = scmp.ne.s32.totalorder %s1158_s20, %s817_s8  ;;  %p822_p7 = scmp.lt.u32.totalorder %s1158_s20, %s1247_s3 }
  0x8a   : > { %p823_p0 = scmp.lt.u32.totalorder %s821_s13, %s817_s8  ;;  %p825_p12 = scmp.lt.u32.totalorder %s817_s8, %s1158_s20 }
  0x8b   : > { %p819_p6 = pnand %p818_p9, %p1272_p2 }
  0x8c   : > { %p824_p4 = por %p823_p0, %p822_p7 }
  0x8d   : > { %p820_p13 = pneg %p819_p6 }
  0x8e   : > { %p826_p3 = por %p825_p12, %p824_p4 }
  0x90   : > { %p827_p10 = pnand %p826_p3, %p820_p13 }
  0x92   : > { %830 = shalt.err (!%p827_p10)
}
  0x93   : > { %617 = dma.vmem_to_hbm [thread:$0]  (%p1272_p2), %s1160_s18, 256, %s1158_s20, %s392_s9   ;;  %390 = vst [vmem:[%s1151_s24 + $0x8] sm:$0xff] %v386_v21 }
  0x94   : > { %s397_s26 = scalar_lea.sflag [#allocation10], %s1145_s14  ;;  %s831_s28 = scalar_lea.vmem %s1168_s25, 256 }
  0x95   : > { %p832_p11 = scmp.ne.s32.totalorder %s1168_s25, %s831_s28  ;;  %s948_s7 = smov [#allocation9]  }
  0x96   : > { %s835_s10 = sshll.u32 %s948_s7, 4  ;;  %s836_s10 = int_to_ptr.vmem [resolvable:$false] %s835_s10 }
  0x97   : > { %p833_p1 = pnand %p832_p11, %p1272_p2  ;;  %s837_s12 = scalar_lea.vmem %s836_s10, 512 }
  0x98   : > { %p838_p8 = scmp.lt.s32.totalorder %s1168_s25, %s836_s10  ;;  %p839_p9 = scmp.lt.s32.totalorder %s837_s12, %s831_s28 }
  0x99   : > { %p834_p5 = pneg %p833_p1 }
  0x9a   : > { %p840_p6 = por %p839_p9, %p838_p8 }
  0x9c   : > { %p841_p13 = pnand %p840_p6, %p834_p5 }
  0x9e   : > { %844 = shalt.err (!%p841_p13)
}
  0x9f   : > { %s845_s14 = scalar_lea.hbm %s1166_s29, 256  ;;  %s849_s20 = scalar_lea.hbm %s1248_s4, 512 }
  0xa0   : > { %p846_p7 = scmp.ne.s32.totalorder %s1166_s29, %s845_s14  ;;  %p850_p12 = scmp.lt.u32.totalorder %s1166_s29, %s1248_s4 }
  0xa1   : > { %p851_p3 = scmp.lt.u32.totalorder %s849_s20, %s845_s14  ;;  %p853_p11 = scmp.lt.u32.totalorder %s845_s14, %s1166_s29 }
  0xa2   : > { %p847_p0 = pnand %p846_p7, %p1272_p2 }
  0xa3   : > { %p852_p10 = por %p851_p3, %p850_p12 }
  0xa4   : > { %p848_p4 = pneg %p847_p0 }
  0xa5   : > { %p854_p1 = por %p853_p11, %p852_p10 }
  0xa7   : > { %p855_p5 = pnand %p854_p1, %p848_p4 }
  0xa9   : > { %858 = shalt.err (!%p855_p5)
}
  0xaa   : > { %618 = dma.vmem_to_hbm [thread:$0]  (%p1272_p2), %s1168_s25, 256, %s1166_s29, %s397_s26  }
  0xab PF: > { %s437_s8 = sand.u32 1, %s914_s15   ;;  %p1273_p8 = scmp.ne.s32.totalorder %s1261_s6, 0 }
  0xac   : > { %p1274_p9 = scmp.ge.s32.totalorder %s942_s22, 2  ;;  %s438_s23 = scalar_lea.sflag [#allocation4], %s437_s8 }
  0xae   : > { %p632_p6 = pnand %p1274_p9, %p1273_p8 }
  0xb0   : > { %904 = dma.done.wait (!%p632_p6), %s438_s23, 256  }
  0xb1   : > { %906 = vsyncadd (!%p632_p6), %s438_s23, 4294967040  ;;  %s447_s27 = scalar_lea.sflag [#allocation10], %s437_s8 }
  0xb2   : > { %908 = dma.done.wait (!%p632_p6), %s447_s27, 256  }
  0xb3   : > { %910 = vsyncadd (!%p632_p6), %s447_s27, 4294967040  ;;  %s27_s22 = sadd.s32 1, %s942_s22   ;;  %s1275_s20 = sld [smem:[#allocation15_spill]] }
  0xb4   : > { %p24_p13 = scmp.ge.s32.totalorder %s27_s22, 4   ;;  %s1276_s21 = sld [smem:[#allocation16_spill]] }
  0xb5   : > { %s1277_s15 = smov %s918_s16  ;;  %s1278_s16 = smov %s922_s17 }
  0xb6   : > { %s1279_s17 = smov %s1035_s30  ;;  %s1280_s18 = smov %s930_s19 }
  0xb7   : > { %s1234_s19 = smov 0   ;;  %26 = sbr.rel (!%p24_p13) target bundleno = 13 (0xd), region = 122 }
  0xbe   :  { %452 = vsyncpa [#allocation3], 1 }
  0xbf   :  { %454 = vsyncpa [#allocation3 + $0x1], 1 }
  0xc0   :  { %455 = vsyncpa [#allocation6], 1 }
  0xc1   :  { %457 = vsyncpa [#allocation6 + $0x1], 1 }
  0xc2   :  { %458 = vsyncpa [#allocation4], 1 }
  0xc3   :  { %460 = vsyncpa [#allocation4 + $0x1], 1 }
  0xc4   :  { %461 = vsyncpa [#allocation10], 1 }
  0xc5   :  { %463 = vsyncpa [#allocation10 + $0x1], 1 }

</bundles_post_ra>
